<compile_context>
chip_gen: v5e
topology: v5e:2x2
jax: 0.10.0
libtpu: 0.0.40
codegen_flags: <defaults>
</compile_context>

<pallas_src>
import math
import jax
import jax.numpy as jnp
from jax.experimental import pallas as pl
from jax.experimental.pallas import tpu as pltpu


def _embed_kernel(p_ref, w_ref, shift_ref, o_ref):
    # Conv-as-matmul on the MXU: [N, K] @ [K, T] -> [N, T], f32 accumulation.
    acc = jnp.dot(w_ref[...], p_ref[...], preferred_element_type=jnp.float32)
    # Folded (conv-bias + BN) shift, then SiLU.  Epilogue math in f32; cast to the
    # bf16 output dtype only at the final store.
    y = acc + shift_ref[...]
    o_ref[...] = (y * jax.nn.sigmoid(y)).astype(o_ref.dtype)


def overlap_patch_embed(x, weight, bias, bn_gamma, bn_beta, bn_mean, bn_var,
                        *, stride, padding, eps=1e-5, tile_hw=1024):
    """x: [B, Cin, H, W] (NCHW, matches PyTorch). weight: [N, Cin, kh, kw] (OIHW).

    Returns (y_bf16 [B, N, Ho, Wo], Ho, Wo)."""
    B, C, H, W = x.shape
    N, _, kh, kw = weight.shape
    ph, pw = padding

    Ho = (H + 2 * ph - kh) // stride + 1
    Wo = (W + 2 * pw - kw) // stride + 1
    K = C * kh * kw
    HW = Ho * Wo

    # ---- channel-first im2col: [B, K, Ho, Wo], feature dim ordered (C, kh, kw), ----
    # ---- which matches weight.reshape(N, C*kh*kw).  Extraction is pure selection ----
    # ---- so the bf16 cast here is exact relative to casting patches afterwards.  ----
    patches = jax.lax.conv_general_dilated_patches(
        x.astype(jnp.bfloat16),
        filter_shape=(kh, kw),
        window_strides=(stride, stride),
        padding=((ph, ph), (pw, pw)),
        dimension_numbers=("NCHW", "OIHW", "NCHW"))
    patches = patches.reshape(B, K, HW)            # bf16, no further copies / pads

    # ---- fold conv bias + BN (inference) into the weight and one shift vector ----
    # TODO(synk): training-mode BN (batch statistics + running-stat updates) not
    #             implemented; inference-mode BN is used instead.
    inv_std = 1.0 / jnp.sqrt(bn_var.astype(jnp.float32) + eps)
    scale = bn_gamma.astype(jnp.float32) * inv_std                              # [N]
    shift = bn_beta.astype(jnp.float32) + \
        (bias.astype(jnp.float32) - bn_mean.astype(jnp.float32)) * scale        # [N]
    w2d = (weight.reshape(N, K).astype(jnp.float32) * scale[:, None]) \
        .astype(jnp.bfloat16)                                                   # [N, K]
    shift = shift.reshape(N, 1).astype(jnp.float32)                             # [N, 1]

    # ---- tile the flattened output-spatial (lane) dim ----
    tile_hw = max(128, (int(tile_hw) // 128) * 128)
    if HW <= tile_hw:
        t = HW                       # block == full dim: no alignment constraint
        n_hw = 1
    else:
        t = tile_hw                  # 128-multiple tile; ragged tail handled by cdiv
        n_hw = pl.cdiv(HW, t)
    grid = (B, n_hw)

    cost = pl.CostEstimate(
        flops=2 * B * HW * K * N,
        transcendentals=B * HW * N,
        bytes_accessed=B * K * HW * 2 + N * K * 2 + N * 4 + B * N * HW * 2)

    out = pl.pallas_call(
        _embed_kernel,
        out_shape=jax.ShapeDtypeStruct((B, N, HW), jnp.bfloat16),
        grid=grid,
        in_specs=[
            pl.BlockSpec((None, K, t), lambda b, j: (b, 0, j)),   # patches tile [K, t]
            pl.BlockSpec((N, K), lambda b, j: (0, 0)),            # folded weight (resident)
            pl.BlockSpec((N, 1), lambda b, j: (0, 0)),            # folded shift  (resident)
        ],
        out_specs=pl.BlockSpec((None, N, t), lambda b, j: (b, 0, j)),
        compiler_params=pltpu.CompilerParams(
            dimension_semantics=("parallel", "parallel")),
        cost_estimate=cost,
    )(patches, w2d, shift)

    # [B, N, HW] -> NCHW is a free reshape (no transpose).
    out = out.reshape(B, N, Ho, Wo)
    return out, Ho, Wo


def _reference(x, weight, bias, bn_gamma, bn_beta, bn_mean, bn_var, *, stride, padding, eps=1e-5):
    y = jax.lax.conv_general_dilated(
        x.astype(jnp.float32), weight.astype(jnp.float32),
        window_strides=(stride, stride),
        padding=((padding[0], padding[0]), (padding[1], padding[1])),
        dimension_numbers=("NCHW", "OIHW", "NCHW"))
    y = y + bias.reshape(1, -1, 1, 1)
    y = (y - bn_mean.reshape(1, -1, 1, 1)) / jnp.sqrt(bn_var.reshape(1, -1, 1, 1) + eps)
    y = y * bn_gamma.reshape(1, -1, 1, 1) + bn_beta.reshape(1, -1, 1, 1)
    return y * jax.nn.sigmoid(y)


if __name__ == "__main__":
    # Small, module-consistent shapes: img=16, patch=7, stride=4, in_chans=4, embed_dim=32.
    B, Cin, Himg, Wimg = 2, 4, 16, 16
    patch, stride, embed_dim = 7, 4, 32
    pad = (patch // 2, patch // 2)

    key = jax.random.PRNGKey(0)
    k_x, k_w = jax.random.split(key)

    x = jax.random.normal(k_x, (B, Cin, Himg, Wimg), dtype=jnp.float32)

    # Conv2d init per _init_weights: normal(0, sqrt(2 / fan_out)), bias = 0
    fan_out = patch * patch * embed_dim
    weight = jax.random.normal(k_w, (embed_dim, Cin, patch, patch), dtype=jnp.float32) \
        * math.sqrt(2.0 / fan_out)
    bias = jnp.zeros((embed_dim,), jnp.float32)

    # BatchNorm2d freshly initialized, inference-mode statistics.
    bn_gamma = jnp.ones((embed_dim,), jnp.float32)
    bn_beta = jnp.zeros((embed_dim,), jnp.float32)
    bn_mean = jnp.zeros((embed_dim,), jnp.float32)
    bn_var = jnp.ones((embed_dim,), jnp.float32)

    out, Ho, Wo = overlap_patch_embed(
        x, weight, bias, bn_gamma, bn_beta, bn_mean, bn_var,
        stride=stride, padding=pad)
    out = jax.block_until_ready(out)

    ref = _reference(x, weight, bias, bn_gamma, bn_beta, bn_mean, bn_var,
                     stride=stride, padding=pad)
    assert out.shape == (B, embed_dim, Ho, Wo), out.shape
    assert Ho == 4 and Wo == 4
    out_f32 = out.astype(jnp.float32)
    # Tolerance relaxed vs pure-f32: matmul operands and the stored output are bf16
    # (f32 accumulation / epilogue); expected error is O(1e-3) at these magnitudes.
    assert jnp.allclose(out_f32, ref, atol=2e-2, rtol=2e-2), \
        float(jnp.max(jnp.abs(out_f32 - ref)))

    print("KERNEL_OK")
</pallas_src>

<mosaic_0001>
module attributes {stable_mosaic.version = 11 : i64} {
  func.func @_embed_kernel(%arg0: i32, %arg1: i32, %arg2: memref<1x196x16xbf16, #tpu.memory_space<vmem>>, %arg3: memref<32x196xbf16, #tpu.memory_space<vmem>>, %arg4: memref<32x1xf32, #tpu.memory_space<vmem>>, %arg5: memref<1x32x16xbf16, #tpu.memory_space<vmem>>) attributes {dimension_semantics = [#tpu.dimension_semantics<parallel>, #tpu.dimension_semantics<parallel>], iteration_bounds = array<i64: 2, 1>, scalar_prefetch = 0 : i64, scratch_operands = 0 : i64, tpu.core_type = #tpu.core_type<tc>, window_params = [{transform_indices = @transform_0, window_bounds = array<i64: 1, 196, 16>}, {pipeline_mode = #tpu.pipeline_mode<synchronous>, transform_indices = @transform_1, window_bounds = array<i64: 32, 196>}, {pipeline_mode = #tpu.pipeline_mode<synchronous>, transform_indices = @transform_2, window_bounds = array<i64: 32, 1>}, {transform_indices = @transform_3, window_bounds = array<i64: 1, 32, 16>}]} {
    %c0 = arith.constant 0 : index
    %c0_0 = arith.constant 0 : index
    %0 = vector.load %arg3[%c0, %c0_0] : memref<32x196xbf16, #tpu.memory_space<vmem>>, vector<32x196xbf16>
    %c0_1 = arith.constant 0 : index
    %c0_2 = arith.constant 0 : index
    %c0_3 = arith.constant 0 : index
    %1 = vector.load %arg2[%c0_1, %c0_2, %c0_3] : memref<1x196x16xbf16, #tpu.memory_space<vmem>>, vector<1x196x16xbf16>
    %2 = vector.shape_cast %1 : vector<1x196x16xbf16> to vector<196x16xbf16>
    %cst = arith.constant dense<0.000000e+00> : vector<32x16xf32>
    %3 = tpu.matmul %0, %2, %cst {dimension_numbers = #tpu.dot_dimension_numbers<[1], [0], [0], [1], [0, 0, 1, 1], [], []>} : vector<32x196xbf16>, vector<196x16xbf16>, vector<32x16xf32> -> vector<32x16xf32>
    %c0_4 = arith.constant 0 : index
    %c0_5 = arith.constant 0 : index
    %4 = vector.load %arg4[%c0_4, %c0_5] : memref<32x1xf32, #tpu.memory_space<vmem>>, vector<32x1xf32>
    %5 = vector.broadcast %4 : vector<32x1xf32> to vector<32x16xf32>
    %6 = arith.addf %3, %5 : vector<32x16xf32>
    %7 = arith.negf %6 : vector<32x16xf32>
    %8 = math.exp %7 : vector<32x16xf32>
    %cst_6 = arith.constant 1.000000e+00 : f32
    %9 = vector.broadcast %cst_6 : f32 to vector<32x16xf32>
    %10 = arith.addf %9, %8 : vector<32x16xf32>
    %11 = arith.divf %9, %10 : vector<32x16xf32>
    %12 = arith.mulf %6, %11 : vector<32x16xf32>
    %13 = arith.truncf %12 : vector<32x16xf32> to vector<32x16xbf16>
    %c0_7 = arith.constant 0 : index
    %c0_8 = arith.constant 0 : index
    %c0_9 = arith.constant 0 : index
    %14 = vector.load %arg5[%c0_7, %c0_8, %c0_9] : memref<1x32x16xbf16, #tpu.memory_space<vmem>>, vector<1x32x16xbf16>
    %15 = vector.shape_cast %14 : vector<1x32x16xbf16> to vector<32x16xbf16>
    %16 = vector.shape_cast %13 : vector<32x16xbf16> to vector<1x32x16xbf16>
    tpu.vector_store %arg5[%c0_7, %c0_8, %c0_9], %16 {strides = array<i32>} : memref<1x32x16xbf16, #tpu.memory_space<vmem>>, vector<1x32x16xbf16>,
    return
  }
  func.func @transform_0(%arg0: i32, %arg1: i32) -> (i32, i32, i32) {
    %c0_i32 = arith.constant 0 : i32
    %c0_i32_0 = arith.constant 0 : i32
    return %arg0, %c0_i32, %arg1 : i32, i32, i32
  }
  func.func @transform_1(%arg0: i32, %arg1: i32) -> (i32, i32) {
    %c0_i32 = arith.constant 0 : i32
    %c0_i32_0 = arith.constant 0 : i32
    %c0_i32_1 = arith.constant 0 : i32
    return %c0_i32, %c0_i32_0 : i32, i32
  }
  func.func @transform_2(%arg0: i32, %arg1: i32) -> (i32, i32) {
    %c0_i32 = arith.constant 0 : i32
    %c0_i32_0 = arith.constant 0 : i32
    %c0_i32_1 = arith.constant 0 : i32
    return %c0_i32, %c0_i32_0 : i32, i32
  }
  func.func @transform_3(%arg0: i32, %arg1: i32) -> (i32, i32, i32) {
    %c0_i32 = arith.constant 0 : i32
    %c0_i32_0 = arith.constant 0 : i32
    return %arg0, %c0_i32, %arg1 : i32, i32, i32
  }
}

</mosaic_0001>

<bundles_post_ra>
// kernel: tpu_custom_call.1
= control target key start
LH: loop header
LB: loop body
LE: loop exit
PB: predicated region body
PF: predicated region fallthrough
CT: control target
= control target key end

     0   :  { %s769_s12 = smov 0   ;;  %s771_s13 = smov 0   ;;  %s879_s0 = inlined_call_operand.vmem [shape: bf16[2,196,16], index: 0, kind: input, shape index: {}]   ;;  %s880_s1 = inlined_call_operand.vmem [shape: bf16[32,196], index: 1, kind: input, shape index: {}]   ;;  %s881_s2 = inlined_call_operand.vmem [shape: f32[32,1], index: 2, kind: input, shape index: {}]   ;;  %s882_s3 = inlined_call_operand.vmem [shape: bf16[2,32,16], index: 3, kind: output, shape index: {}]  }
   0x1   :  { %s773_s14 = smov 0  }
   0x2 LB: > { %s25_s15 = sadd.s32 1, %s742_s13  ;;  %p574_p0 = scmp.ge.s32.totalorder %s746_s14, 1  ;;  %s746_s14 = sphi %s773_s14, %s13_s14   ;;  %s742_s13 = sphi %s771_s13, %s884_s13   ;;  %s738_s12 = sphi %s769_s12, %s883_s12  }
   0x3   : > { %p27_p1 = scmp.ge.s32.totalorder %s25_s15, 2  ;;  %p156_p2 = scmp.lt.s32.totalorder %s746_s14, 3 }
   0x5   : > { %s886_s15 = smov (%p27_p1, %s25_s15), 0  ;;  %p157_p3 = pnand %p574_p0, %p156_p2 }
   0x6   : > { %p186_p4 = scmp.lt.s32.totalorder (!%p157_p3), %s738_s12, 1 }
   0x7   : > { %160 = sbr.rel (%p157_p3) target bundleno = 225 (0xe1), region = 32 }
   0xc   : > { %s888_s12 = smov (!%p186_p4, %s738_s12), 1  ;;  %vm356_vm0 = vcmask 1041408   ;;  %v748_v5 = vmov 0   ;;  %v234_v6 = vld [vmem:[%s881_s2 + $0x10] sm:$0xff]  ;;  %v232_v7 = vld [vmem:[%s881_s2] sm:$0xff]  ;;  %v235_v12 = vld [vmem:[%s881_s2 + $0x18] sm:$0xff] }
   0xd   : > { %s680_s16 = smul.u32 100, %s888_s12  ;;  %707 = vset.pattern.permute.xlu1 %v748_v5  ;;  %706 = vset.pattern.permute.xlu0 %v748_v5  ;;  %v233_v13 = vld [vmem:[%s881_s2 + $0x8] sm:$0xff]  ;;  %v653_v19 = vld [vmem:[%s880_s1 + $0x14] sm:$0xf]  ;;  %v590_v20 = vld [vmem:[%s880_s1 + $0x18] sm:$0xf0] }
   0xe   : > { %248 = vperm.xlu1 %707, %v234_v6   ;;  %238 = vperm.xlu0 %706, %v232_v7   ;;  %v651_v21 = vld [vmem:[%s880_s1 + $0x4] sm:$0xf]  ;;  %v582_v22 = vld [vmem:[%s880_s1 + $0x8] sm:$0xf0]  ;;  %v593_v24 = vor.u32 %v653_v19, %v590_v20  ;;  %vm349_vm1 = vcmask 556032   ;;  %vm482_vm7 = vcmask 125952  }
   0xf   : > { %s793_s19 = scalar_lea.vmem %s879_s0, %s680_s16  ;;  %v585_v25 = vor.u32 %v651_v21, %v582_v22  ;;  %v580_v26 = vld [vmem:[%s880_s1] sm:$0xf]  ;;  %v652_v27 = vld [vmem:[%s880_s1 + $0x4] sm:$0xf0]  ;;  %v588_v29 = vld [vmem:[%s880_s1 + $0x10] sm:$0xf] }
  0x10   : > { %v662_v0 = vld [vmem:[%s793_s19 + $0x38] sm:$0xff]  ;;  %v231_v1 = vld [vmem:[%s793_s19 + $0x60] sm:$0x3]  ;;  %v661_v3 = vld [vmem:[%s793_s19 + $0x30] sm:$0xff]  ;;  %v581_v31 = vor.u32 %v652_v27, %v580_v26 }
  0x11   : > { %v323_v2 = vunpack.c.l.b16 %v231_v1  ;;  %360 = vmatpush.bf16.msra.mxu0 %v662_v0  ;;  %667 = vmatpush.bf16.msra.mxu2 %v662_v0  ;;  %v660_v9 = vld [vmem:[%s793_s19 + $0x28] sm:$0xff]  ;;  %v666_v10 = vld [vmem:[%s793_s19 + $0x58] sm:$0xff]  ;;  %v659_v11 = vld [vmem:[%s793_s19 + $0x20] sm:$0xff] }
  0x12   : > { %v665_v14 = vld [vmem:[%s793_s19 + $0x50] sm:$0xff]  ;;  %v658_v15 = vld [vmem:[%s793_s19 + $0x18] sm:$0xff]  ;;  %v664_v16 = vld [vmem:[%s793_s19 + $0x48] sm:$0xff] }
  0x13   : > { %v336_v4 = vpack.c.b16 %v323_v2, %v323_v2  ;;  %v657_v17 = vld [vmem:[%s793_s19 + $0x10] sm:$0xff]  ;;  %v663_v18 = vld [vmem:[%s793_s19 + $0x40] sm:$0xff]  ;;  %v656_v23 = vld [vmem:[%s793_s19 + $0x8] sm:$0xff] }
  0x14   : > { %v655_v28 = vld [vmem:[%s793_s19] sm:$0xff]  ;;  %v654_v30 = vld [vmem:[%s880_s1 + $0x14] sm:$0xf0]  ;;  %s650_s19 = sshll.u32 %s888_s12, 4 }
  0x15   : > { %v358_v8 = vsel %vm356_vm0, %v336_v4, 0  ;;  %361 = vmatpush.bf16.msra.mxu0 %v661_v3  ;;  %668 = vmatpush.bf16.msra.mxu2 %v661_v3  ;;  %v589_v32 = vor.u32 %v654_v30, %v588_v29  ;;  %s857_s24 = scalar_lea.vmem %s882_s3, %s650_s19 }
  0x16   : > { %675 = vmatpush.bf16.msra.mxu3 %v358_v8  ;;  %382 = vmatpush.bf16.msra.mxu1 %v358_v8 }
  0x17   : > { %253 = vperm.xlu1 %707, %v235_v12   ;;  %243 = vperm.xlu0 %706, %v233_v13  }
  0x19   : > { %362 = vmatpush.bf16.msra.mxu0 %v660_v9  ;;  %669 = vmatpush.bf16.msra.mxu2 %v660_v9 }
  0x1a   : > { %676 = vmatpush.bf16.msra.mxu3 %v666_v10  ;;  %383 = vmatpush.bf16.msra.mxu1 %v666_v10 }
  0x1d   : > { %363 = vmatpush.bf16.msra.mxu0 %v659_v11  ;;  %670 = vmatpush.bf16.msra.mxu2 %v659_v11 }
  0x1e   : > { %677 = vmatpush.bf16.msra.mxu3 %v665_v14  ;;  %384 = vmatpush.bf16.msra.mxu1 %v665_v14 }
  0x21   : > { %364 = vmatpush.bf16.msra.mxu0 %v658_v15  ;;  %671 = vmatpush.bf16.msra.mxu2 %v658_v15 }
  0x22   : > { %678 = vmatpush.bf16.msra.mxu3 %v664_v16  ;;  %385 = vmatpush.bf16.msra.mxu1 %v664_v16 }
  0x25   : > { %365 = vmatpush.bf16.msra.mxu0 %v657_v17  ;;  %672 = vmatpush.bf16.msra.mxu2 %v657_v17 }
  0x26   : > { %679 = vmatpush.bf16.msra.mxu3 %v663_v18  ;;  %386 = vmatpush.bf16.msra.mxu1 %v663_v18 }
  0x29   : > { %366 = vmatpush.bf16.msra.mxu0 %v656_v23  ;;  %673 = vmatpush.bf16.msra.mxu2 %v656_v23 }
  0x2a   : > { %643 = vmatmul.msk.bf16.vlgmr.msra.gmra.mxu3 %vm349_vm1, %v593_v24  ;;  %642 = vmatmul.msk.bf16.vlgmr.msra.gmra.mxu1 %vm349_vm1, %v585_v25 }
  0x2d   : > { %367 = vmatpush.bf16.msra.mxu0 %v655_v28  ;;  %674 = vmatpush.bf16.msra.mxu2 %v655_v28 }
  0x30   : > { %368 = vmatmul.bf16.vlgmr.msra.gmra.mxu0 %v581_v31  ;;  %373 = vmatmul.bf16.vlgmr.msra.gmra.mxu2 %v589_v32 }
  0x80   : > { %v239_v33 = vpop.permute.xlu0 %238  ;;  %v249_v38 = vpop.permute.xlu1 %248 }
  0x89   : > { %v244_v43 = vpop.permute.xlu0 %243  ;;  %v254_v53 = vpop.permute.xlu1 %253 }
  0xa7   : > { %v388_v35 = vpop.f32.mrf.mxu1 }
  0xad   : > { %v369_v34 = vpop.f32.mrf.mxu0  ;;  %v393_v40 = vpop.f32.mrf.mxu3 }
  0xae   : > { %v370_v36 = vadd.f32 %v369_v34, %v239_v33 }
  0xaf   : > { %v390_v47 = vpop.f32.mrf.mxu1 }
  0xb0   : > { %v389_v37 = vadd.f32 %v388_v35, %v370_v36 }
  0xb2   : > { %v644_v39 = vmul.f32 -1.442695, %v389_v37 }
  0xb3   : > { %v374_v41 = vpop.f32.mrf.mxu2 }
  0xb4   : > { %708 = vpow2.f32 %v644_v39  ;;  %v375_v42 = vadd.f32 %v374_v41, %v249_v38 }
  0xb5   : > { %v371_v44 = vpop.f32.mrf.mxu0  ;;  %v395_v56 = vpop.f32.mrf.mxu3 }
  0xb6   : > { %v844_v45 = vadd.f32 %v393_v40, %v375_v42  ;;  %v372_v46 = vadd.f32 %v371_v44, %v244_v43 }
  0xb8   : > { %v646_v48 = vmul.f32 -1.442695, %v844_v45  ;;  %v847_v49 = vadd.f32 %v390_v47, %v372_v46 }
  0xba   : > { %v709_v50 = vpop.eup %708  ;;  %710 = vpow2.f32 %v646_v48  ;;  %v645_v51 = vmul.f32 -1.442695, %v847_v49 }
  0xbb   : > { %v410_v52 = vadd.f32 1.0, %v709_v50  ;;  %v376_v54 = vpop.f32.mrf.mxu2 }
  0xbc   : > { %712 = vpow2.f32 %v645_v51  ;;  %v377_v55 = vadd.f32 %v376_v54, %v254_v53 }
  0xbd   : > { %714 = vrcp.f32 %v410_v52  ;;  %v425_v2 = vand.u32 2147483648, %v410_v52  ;;  %vm419_vm2 = vweird.f32 %v410_v52  ;;  %v423_v5 = vand.u32 2147483647, %v410_v52 }
  0xbe   : > { %v850_v57 = vadd.f32 %v395_v56, %v377_v55 }
  0xbf   : > { %v426_v10 = vor.u32 1.1754944e-38, %v425_v2  ;;  %vm424_vm5 = vcmp.eq.f32.partialorder %v423_v5, 8.507059e+37 }
  0xc0   : > { %v711_v58 = vpop.eup %710  ;;  %v647_v59 = vmul.f32 -1.442695, %v850_v57 }
  0xc1   : > { %v412_v60 = vadd.f32 1.0, %v711_v58 }
  0xc2   : > { %v713_v61 = vpop.eup %712  ;;  %716 = vpow2.f32 %v647_v59 }
  0xc3   : > { %v715_v62 = vpop.eup %714  ;;  %718 = vrcp.f32 %v412_v60  ;;  %v411_v0 = vadd.f32 1.0, %v713_v61  ;;  %v455_v15 = vand.u32 2147483648, %v412_v60  ;;  %v453_v19 = vand.u32 2147483647, %v412_v60 }
  0xc4   : > { %v415_v63 = vmul.f32 %v715_v62, %v410_v52  ;;  %vm420_vm3 = vweird.f32 %v715_v62  ;;  %vm449_vm8 = vweird.f32 %v412_v60 }
  0xc5   : > { %720 = vrcp.f32 %v411_v0  ;;  %vm421_vm4 = vmor %vm419_vm2, %vm420_vm3  ;;  %v440_v23 = vand.u32 2147483648, %v411_v0  ;;  %v456_v25 = vor.u32 1.1754944e-38, %v455_v15  ;;  %v438_v27 = vand.u32 2147483647, %v411_v0 }
  0xc6   : > { %v416_v1 = vsub.f32 1.0, %v415_v63  ;;  %vm454_vm11 = vcmp.eq.f32.partialorder %v453_v19, 8.507059e+37  ;;  %vm434_vm12 = vweird.f32 %v411_v0 }
  0xc7   : > { %v441_v33 = vor.u32 1.1754944e-38, %v440_v23  ;;  %vm439_vm14 = vcmp.eq.f32.partialorder %v438_v27, 8.507059e+37 }
  0xc8   : > { %v717_v3 = vpop.eup %716  ;;  %v417_v4 = vmul.f32 %v715_v62, %v416_v1 }
  0xc9   : > { %v719_v6 = vpop.eup %718  ;;  %v413_v7 = vadd.f32 1.0, %v717_v3 }
  0xca   : > { %v418_v8 = vadd.f32 %v715_v62, %v417_v4  ;;  %v445_v9 = vmul.f32 %v719_v6, %v412_v60  ;;  %vm450_vm6 = vweird.f32 %v719_v6 }
  0xcb   : > { %722 = vrcp.f32 %v413_v7  ;;  %v721_v11 = vpop.eup %720  ;;  %vm451_vm9 = vmor %vm449_vm8, %vm450_vm6  ;;  %v468_v36 = vand.u32 2147483647, %v413_v7  ;;  %vm464_vm0 = vweird.f32 %v413_v7 }
  0xcc   : > { %v422_v12 = vsel %vm421_vm4, %v715_v62, %v418_v8  ;;  %v446_v13 = vsub.f32 1.0, %v445_v9  ;;  %v430_v16 = vmul.f32 %v721_v11, %v411_v0  ;;  %vm435_vm10 = vweird.f32 %v721_v11 }
  0xcd   : > { %v427_v14 = vsel %vm424_vm5, %v426_v10, %v422_v12  ;;  %vm436_vm13 = vmor %vm434_vm12, %vm435_vm10  ;;  %vm469_vm2 = vcmp.eq.f32.partialorder %v468_v36, 8.507059e+37 }
  0xce   : > { %v474_v17 = vmul.f32 %v427_v14, %v389_v37  ;;  %v447_v18 = vmul.f32 %v719_v6, %v446_v13  ;;  %v431_v20 = vsub.f32 1.0, %v430_v16  ;;  %v470_v37 = vand.u32 2147483648, %v413_v7 }
  0xd0   : > { %v478_v21 = vpack.c.bf16 %v474_v17, %v474_v17  ;;  %v448_v22 = vadd.f32 %v719_v6, %v447_v18  ;;  %v432_v26 = vmul.f32 %v721_v11, %v431_v20  ;;  %v471_v44 = vor.u32 1.1754944e-38, %v470_v37 }
  0xd1   : > { %v723_v24 = vpop.eup %722 }
  0xd2   : > { %483 = vst.msk [vmem:[%s857_s24] sm:$0xf] %vm482_vm7, %v478_v21  ;;  %v452_v28 = vsel %vm451_vm9, %v719_v6, %v448_v22  ;;  %v460_v29 = vmul.f32 %v723_v24, %v413_v7  ;;  %v433_v31 = vadd.f32 %v721_v11, %v432_v26  ;;  %vm465_vm15 = vweird.f32 %v723_v24 }
  0xd3   : > { %v457_v30 = vsel %vm454_vm11, %v456_v25, %v452_v28  ;;  %vm466_vm1 = vmor %vm464_vm0, %vm465_vm15 }
  0xd4   : > { %v476_v32 = vmul.f32 %v457_v30, %v844_v45  ;;  %v461_v34 = vsub.f32 1.0, %v460_v29  ;;  %v437_v35 = vsel %vm436_vm13, %v721_v11, %v433_v31 }
  0xd5   : > { %v442_v39 = vsel %vm439_vm14, %v441_v33, %v437_v35 }
  0xd6   : > { %v480_v38 = vpack.c.bf16 %v476_v32, %v476_v32  ;;  %v462_v40 = vmul.f32 %v723_v24, %v461_v34  ;;  %v475_v41 = vmul.f32 %v442_v39, %v847_v49 }
  0xd8   : > { %485 = vst.msk [vmem:[%s857_s24 + $0x8] sm:$0xf] %vm482_vm7, %v480_v38  ;;  %v463_v42 = vadd.f32 %v723_v24, %v462_v40  ;;  %v479_v43 = vpack.c.bf16 %v475_v41, %v475_v41 }
  0xda   : > { %v467_v45 = vsel %vm466_vm1, %v723_v24, %v463_v42  ;;  %484 = vst.msk [vmem:[%s857_s24 + $0x4] sm:$0xf] %vm482_vm7, %v479_v43 }
  0xdb   : > { %v472_v46 = vsel %vm469_vm2, %v471_v44, %v467_v45 }
  0xdc   : > { %v477_v47 = vmul.f32 %v472_v46, %v850_v57 }
  0xde   : > { %v481_v48 = vpack.c.bf16 %v477_v47, %v477_v47 }
  0xe0   : > { %486 = vst.msk [vmem:[%s857_s24 + $0xc] sm:$0xf] %vm482_vm7, %v481_v48 }
  0xe1 PF: > { %s13_s14 = sadd.s32 1, %s746_s14   ;;  %s883_s12 = smov %s742_s13 }
  0xe2   : > { %p10_p5 = scmp.ge.s32.totalorder %s13_s14, 4   ;;  %s884_s13 = smov %s886_s15 }
  0xe4   :  { %12 = sbr.rel (!%p10_p5) target bundleno = 2 (0x2), region = 62 }

</bundles_post_ra>
